<compile_context>
chip_gen: v7x
topology: tpu7x:2x2x1
jax: 0.10.0
libtpu: 0.0.40
codegen_flags: <defaults>
</compile_context>

<pallas_src>
import functools

import jax
import jax.numpy as jnp
from jax.experimental import pallas as pl
from jax.experimental.pallas import tpu as pltpu


def _round_up(x, m):
    return ((x + m - 1) // m) * m


def _pad2d(a, rows, cols):
    return jnp.pad(a, ((0, rows - a.shape[0]), (0, cols - a.shape[1])))


def _gcn_agg_kernel(adj_ref, feat_ref, din_ref, bias_ref, out_ref, acc_ref,
                    *, apply_relu):
    """out[i, :] = rsqrt_din[i] * sum_k adj[i, k] * feat[k, :] + bias (opt relu).

    `feat` already carries the source-side rsqrt(deg_out) scaling (folded in
    the wrapper), so no N x N normalized adjacency is ever materialized.
    """
    k = pl.program_id(1)

    @pl.when(k == 0)
    def _():
        acc_ref[...] = jnp.zeros_like(acc_ref)

    # bf16 x bf16 MXU matmul, f32 accumulation.
    acc_ref[...] += jnp.dot(adj_ref[...], feat_ref[...],
                            preferred_element_type=jnp.float32)

    @pl.when(k == pl.num_programs(1) - 1)
    def _():
        res = acc_ref[...] * din_ref[...] + bias_ref[...]   # f32 VPU elementwise
        if apply_relu:
            res = jnp.maximum(res, 0.0)
        out_ref[...] = res.astype(out_ref.dtype)


def _aggregate(adj_p, feat_p, din_p, bias_p, *, out_dtype, apply_relu, tm, tk):
    n_pad = adj_p.shape[0]
    f_pad = feat_p.shape[1]
    grid = (n_pad // tm, n_pad // tk)

    cost = pl.CostEstimate(
        flops=2 * n_pad * n_pad * f_pad,
        transcendentals=0,
        bytes_accessed=(n_pad * n_pad * adj_p.dtype.itemsize
                        + n_pad * f_pad * feat_p.dtype.itemsize
                        + n_pad * f_pad * jnp.dtype(out_dtype).itemsize),
    )

    return pl.pallas_call(
        functools.partial(_gcn_agg_kernel, apply_relu=apply_relu),
        out_shape=jax.ShapeDtypeStruct((n_pad, f_pad), out_dtype),
        grid_spec=pltpu.PrefetchScalarGridSpec(
            num_scalar_prefetch=0,
            grid=grid,
            in_specs=[
                pl.BlockSpec((tm, tk), lambda i, k: (i, k)),      # adj tile
                pl.BlockSpec((tk, f_pad), lambda i, k: (k, 0)),   # scaled feats
                pl.BlockSpec((tm, 1), lambda i, k: (i, 0)),       # rsqrt(in-deg)
                pl.BlockSpec((1, f_pad), lambda i, k: (0, 0)),    # bias row
            ],
            out_specs=pl.BlockSpec((tm, f_pad), lambda i, k: (i, 0)),
            scratch_shapes=[pltpu.VMEM((tm, f_pad), jnp.float32)],
        ),
        compiler_params=pltpu.CompilerParams(
            dimension_semantics=("parallel", "arbitrary")),
        cost_estimate=cost,
    )(adj_p, feat_p, din_p, bias_p)


def _gcn_forward_impl(adj, x, w1, b1, w2, b2, *, agg_dtype=jnp.bfloat16):
    n = adj.shape[0]
    hidden = w1.shape[1]
    out_feats = w2.shape[1]

    # ---- hoisted degree reduction + rsqrt (plain XLA, once per call) ----
    # out-degree of source j = column sum; in-degree of dest i = row sum.
    rsqrt_dout = jax.lax.rsqrt(jnp.maximum(adj.sum(axis=0), 1.0)).reshape(n, 1)
    rsqrt_din = jax.lax.rsqrt(jnp.maximum(adj.sum(axis=1), 1.0)).reshape(n, 1)

    # ---- adaptive tile / padding geometry -------------------------------
    n128 = _round_up(n, 128)
    if n128 <= 512:
        # Small graph: a single tile on both axes (<= 512KB bf16 adj tile).
        tm = tk = n_pad = n128
    else:
        tm = 256                              # dest-row tile (MXU-friendly)
        n_pad = _round_up(n, tm)              # pad only to the row tile
        # Largest source-col tile (multiple of 256, <= 1024) dividing n_pad.
        tk = max(t for t in range(256, 1025, 256) if n_pad % t == 0)

    h_pad = _round_up(hidden, 128)
    o_pad = _round_up(out_feats, 128)

    adj_p = _pad2d(adj, n_pad, n_pad).astype(agg_dtype)   # 0/1 -> exact in bf16
    din_p = _pad2d(rsqrt_din, n_pad, 1)                   # f32 (N,1)
    dout_p = _pad2d(rsqrt_dout, n_pad, 1)                 # f32 (N,1), zero pad
    b1_p = jnp.pad(b1, (0, h_pad - hidden)).reshape(1, h_pad)
    b2_p = jnp.pad(b2, (0, o_pad - out_feats)).reshape(1, o_pad)
    w2_p = _pad2d(w2, h_pad, o_pad)

    # ---- layer 1: tiny feature matmul + source scaling folded in wrapper ----
    xw_p = _pad2d((x @ w1) * rsqrt_dout, n_pad, h_pad).astype(agg_dtype)
    h1_p = _aggregate(adj_p, xw_p, din_p, b1_p, out_dtype=agg_dtype,
                      apply_relu=True, tm=tm, tk=tk)

    # ---- layer 2: H1@W2 + source scaling in wrapper, aggregation in Pallas ----
    hw_p = ((h1_p.astype(jnp.float32) @ w2_p) * dout_p).astype(agg_dtype)
    out_p = _aggregate(adj_p, hw_p, din_p, b2_p, out_dtype=jnp.float32,
                       apply_relu=False, tm=tm, tk=tk)

    return out_p[:n, :out_feats]


gcn_forward = jax.jit(_gcn_forward_impl, static_argnames=("agg_dtype",))


def gcn_reference(adj, x, w1, b1, w2, b2):
    deg_out = jnp.maximum(adj.sum(axis=0, keepdims=True), 1.0)
    deg_in = jnp.maximum(adj.sum(axis=1, keepdims=True), 1.0)
    a_hat = adj / jnp.sqrt(deg_in) / jnp.sqrt(deg_out)
    h1 = jnp.maximum(a_hat @ (x @ w1) + b1, 0.0)
    return a_hat @ (h1 @ w2) + b2


if __name__ == "__main__":
    # Small synthetic problem: 16 nodes, in_feats=8, hidden=32, out_feats=4.
    N, IN_FEATS, HIDDEN, OUT_FEATS = 16, 8, 32, 4

    key = jax.random.PRNGKey(0)
    k_adj, k_x, k_w1, k_w2 = jax.random.split(key, 4)

    # Deterministic random undirected graph with self-loops (dense adjacency).
    a = (jax.random.uniform(k_adj, (N, N)) < 0.25).astype(jnp.float32)
    adj = jnp.clip(a + a.T + jnp.eye(N, dtype=jnp.float32), 0.0, 1.0)

    x = jax.random.normal(k_x, (N, IN_FEATS), dtype=jnp.float32)

    # Glorot-style deterministic weight init; zero biases (as in GraphConv).
    w1 = jax.random.normal(k_w1, (IN_FEATS, HIDDEN), dtype=jnp.float32) * (
        (2.0 / (IN_FEATS + HIDDEN)) ** 0.5
    )
    b1 = jnp.zeros((HIDDEN,), dtype=jnp.float32)
    w2 = jax.random.normal(k_w2, (HIDDEN, OUT_FEATS), dtype=jnp.float32) * (
        (2.0 / (HIDDEN + OUT_FEATS)) ** 0.5
    )
    b2 = jnp.zeros((OUT_FEATS,), dtype=jnp.float32)

    out = gcn_forward(adj, x, w1, b1, w2, b2)
    jax.block_until_ready(out)

    ref = gcn_reference(adj, x, w1, b1, w2, b2)
    assert out.shape == (N, OUT_FEATS)
    # bf16 aggregation (f32 accumulation) vs pure-f32 reference -> looser tol.
    assert jnp.allclose(out, ref, atol=2e-2, rtol=2e-2), (
        float(jnp.max(jnp.abs(out - ref))))

    print("KERNEL_OK")
</pallas_src>

<mosaic_0001>
module attributes {stable_mosaic.version = 11 : i64} {
  func.func @_gcn_agg_kernel(%arg0: i32, %arg1: i32, %arg2: memref<128x128xbf16, #tpu.memory_space<vmem>>, %arg3: memref<128x128xbf16, #tpu.memory_space<vmem>>, %arg4: memref<128x1xf32, #tpu.memory_space<vmem>>, %arg5: memref<1x128xf32, #tpu.memory_space<vmem>>, %arg6: memref<128x128xbf16, #tpu.memory_space<vmem>>, %arg7: memref<128x128xf32, #tpu.memory_space<vmem>>) attributes {dimension_semantics = [#tpu.dimension_semantics<parallel>, #tpu.dimension_semantics<arbitrary>], iteration_bounds = array<i64: 1, 1>, scalar_prefetch = 0 : i64, scratch_operands = 1 : i64, tpu.core_type = #tpu.core_type<tc>, window_params = [{transform_indices = @transform_0, window_bounds = array<i64: 128, 128>}, {transform_indices = @transform_1, window_bounds = array<i64: 128, 128>}, {transform_indices = @transform_2, window_bounds = array<i64: 128, 1>}, {pipeline_mode = #tpu.pipeline_mode<synchronous>, transform_indices = @transform_3, window_bounds = array<i64: 1, 128>}, {transform_indices = @transform_4, window_bounds = array<i64: 128, 128>}]} {
    %c0_i32 = arith.constant 0 : i32
    %0 = arith.cmpi eq, %arg1, %c0_i32 : i32
    %1 = arith.extui %0 : i1 to i32
    %c0_i32_0 = arith.constant 0 : i32
    %2 = arith.cmpi ne, %1, %c0_i32_0 : i32
    scf.if %2 {
      %cst_10 = arith.constant 0.000000e+00 : f32
      %12 = vector.broadcast %cst_10 : f32 to vector<128x128xf32>
      %c0_11 = arith.constant 0 : index
      %c0_12 = arith.constant 0 : index
      %13 = vector.load %arg7[%c0_11, %c0_12] : memref<128x128xf32, #tpu.memory_space<vmem>>, vector<128x128xf32>
      tpu.vector_store %arg7[%c0_11, %c0_12], %12 {strides = array<i32>} : memref<128x128xf32, #tpu.memory_space<vmem>>, vector<128x128xf32>,
    } else {
    }
    %c0 = arith.constant 0 : index
    %c0_1 = arith.constant 0 : index
    %3 = vector.load %arg7[%c0, %c0_1] : memref<128x128xf32, #tpu.memory_space<vmem>>, vector<128x128xf32>
    %c0_2 = arith.constant 0 : index
    %c0_3 = arith.constant 0 : index
    %4 = vector.load %arg2[%c0_2, %c0_3] : memref<128x128xbf16, #tpu.memory_space<vmem>>, vector<128x128xbf16>
    %c0_4 = arith.constant 0 : index
    %c0_5 = arith.constant 0 : index
    %5 = vector.load %arg3[%c0_4, %c0_5] : memref<128x128xbf16, #tpu.memory_space<vmem>>, vector<128x128xbf16>
    %cst = arith.constant dense<0.000000e+00> : vector<128x128xf32>
    %6 = tpu.matmul %4, %5, %cst {dimension_numbers = #tpu.dot_dimension_numbers<[1], [0], [0], [1], [0, 0, 1, 1], [], []>} : vector<128x128xbf16>, vector<128x128xbf16>, vector<128x128xf32> -> vector<128x128xf32>
    %7 = arith.addf %3, %6 : vector<128x128xf32>
    %c0_6 = arith.constant 0 : index
    %c0_7 = arith.constant 0 : index
    %8 = vector.load %arg7[%c0_6, %c0_7] : memref<128x128xf32, #tpu.memory_space<vmem>>, vector<128x128xf32>
    tpu.vector_store %arg7[%c0_6, %c0_7], %7 {strides = array<i32>} : memref<128x128xf32, #tpu.memory_space<vmem>>, vector<128x128xf32>,
    %c0_i32_8 = arith.constant 0 : i32
    %9 = arith.cmpi eq, %arg1, %c0_i32_8 : i32
    %10 = arith.extui %9 : i1 to i32
    %c0_i32_9 = arith.constant 0 : i32
    %11 = arith.cmpi ne, %10, %c0_i32_9 : i32
    scf.if %11 {
      %c0_10 = arith.constant 0 : index
      %c0_11 = arith.constant 0 : index
      %12 = vector.load %arg7[%c0_10, %c0_11] : memref<128x128xf32, #tpu.memory_space<vmem>>, vector<128x128xf32>
      %c0_12 = arith.constant 0 : index
      %c0_13 = arith.constant 0 : index
      %13 = vector.load %arg4[%c0_12, %c0_13] : memref<128x1xf32, #tpu.memory_space<vmem>>, vector<128x1xf32>
      %14 = vector.broadcast %13 : vector<128x1xf32> to vector<128x128xf32>
      %15 = arith.mulf %12, %14 : vector<128x128xf32>
      %c0_14 = arith.constant 0 : index
      %c0_15 = arith.constant 0 : index
      %16 = vector.load %arg5[%c0_14, %c0_15] : memref<1x128xf32, #tpu.memory_space<vmem>>, vector<1x128xf32>
      %17 = vector.broadcast %16 : vector<1x128xf32> to vector<128x128xf32>
      %18 = arith.addf %15, %17 : vector<128x128xf32>
      %cst_16 = arith.constant 0.000000e+00 : f32
      %19 = vector.broadcast %cst_16 : f32 to vector<128x128xf32>
      %20 = arith.maximumf %18, %19 : vector<128x128xf32>
      %21 = arith.truncf %20 : vector<128x128xf32> to vector<128x128xbf16>
      %c0_17 = arith.constant 0 : index
      %c0_18 = arith.constant 0 : index
      %22 = vector.load %arg6[%c0_17, %c0_18] : memref<128x128xbf16, #tpu.memory_space<vmem>>, vector<128x128xbf16>
      tpu.vector_store %arg6[%c0_17, %c0_18], %21 {strides = array<i32>} : memref<128x128xbf16, #tpu.memory_space<vmem>>, vector<128x128xbf16>,
    } else {
    }
    return
  }
  func.func @transform_0(%arg0: i32, %arg1: i32) -> (i32, i32) {
    %c0_i32 = arith.constant 0 : i32
    return %arg0, %arg1 : i32, i32
  }
  func.func @transform_1(%arg0: i32, %arg1: i32) -> (i32, i32) {
    %c0_i32 = arith.constant 0 : i32
    %c0_i32_0 = arith.constant 0 : i32
    return %arg1, %c0_i32 : i32, i32
  }
  func.func @transform_2(%arg0: i32, %arg1: i32) -> (i32, i32) {
    %c0_i32 = arith.constant 0 : i32
    %c0_i32_0 = arith.constant 0 : i32
    return %arg0, %c0_i32 : i32, i32
  }
  func.func @transform_3(%arg0: i32, %arg1: i32) -> (i32, i32) {
    %c0_i32 = arith.constant 0 : i32
    %c0_i32_0 = arith.constant 0 : i32
    %c0_i32_1 = arith.constant 0 : i32
    return %c0_i32, %c0_i32_0 : i32, i32
  }
  func.func @transform_4(%arg0: i32, %arg1: i32) -> (i32, i32) {
    %c0_i32 = arith.constant 0 : i32
    %c0_i32_0 = arith.constant 0 : i32
    return %arg0, %c0_i32 : i32, i32
  }
}

module attributes {stable_mosaic.version = 11 : i64} {
  func.func @_gcn_agg_kernel(%arg0: i32, %arg1: i32, %arg2: memref<128x128xbf16, #tpu.memory_space<vmem>>, %arg3: memref<128x128xbf16, #tpu.memory_space<vmem>>, %arg4: memref<128x1xf32, #tpu.memory_space<vmem>>, %arg5: memref<1x128xf32, #tpu.memory_space<vmem>>, %arg6: memref<128x128xf32, #tpu.memory_space<vmem>>, %arg7: memref<128x128xf32, #tpu.memory_space<vmem>>) attributes {dimension_semantics = [#tpu.dimension_semantics<parallel>, #tpu.dimension_semantics<arbitrary>], iteration_bounds = array<i64: 1, 1>, scalar_prefetch = 0 : i64, scratch_operands = 1 : i64, tpu.core_type = #tpu.core_type<tc>, window_params = [{transform_indices = @transform_0, window_bounds = array<i64: 128, 128>}, {transform_indices = @transform_1, window_bounds = array<i64: 128, 128>}, {transform_indices = @transform_2, window_bounds = array<i64: 128, 1>}, {pipeline_mode = #tpu.pipeline_mode<synchronous>, transform_indices = @transform_3, window_bounds = array<i64: 1, 128>}, {transform_indices = @transform_4, window_bounds = array<i64: 128, 128>}]} {
    %c0_i32 = arith.constant 0 : i32
    %0 = arith.cmpi eq, %arg1, %c0_i32 : i32
    %1 = arith.extui %0 : i1 to i32
    %c0_i32_0 = arith.constant 0 : i32
    %2 = arith.cmpi ne, %1, %c0_i32_0 : i32
    scf.if %2 {
      %cst_10 = arith.constant 0.000000e+00 : f32
      %12 = vector.broadcast %cst_10 : f32 to vector<128x128xf32>
      %c0_11 = arith.constant 0 : index
      %c0_12 = arith.constant 0 : index
      %13 = vector.load %arg7[%c0_11, %c0_12] : memref<128x128xf32, #tpu.memory_space<vmem>>, vector<128x128xf32>
      tpu.vector_store %arg7[%c0_11, %c0_12], %12 {strides = array<i32>} : memref<128x128xf32, #tpu.memory_space<vmem>>, vector<128x128xf32>,
    } else {
    }
    %c0 = arith.constant 0 : index
    %c0_1 = arith.constant 0 : index
    %3 = vector.load %arg7[%c0, %c0_1] : memref<128x128xf32, #tpu.memory_space<vmem>>, vector<128x128xf32>
    %c0_2 = arith.constant 0 : index
    %c0_3 = arith.constant 0 : index
    %4 = vector.load %arg2[%c0_2, %c0_3] : memref<128x128xbf16, #tpu.memory_space<vmem>>, vector<128x128xbf16>
    %c0_4 = arith.constant 0 : index
    %c0_5 = arith.constant 0 : index
    %5 = vector.load %arg3[%c0_4, %c0_5] : memref<128x128xbf16, #tpu.memory_space<vmem>>, vector<128x128xbf16>
    %cst = arith.constant dense<0.000000e+00> : vector<128x128xf32>
    %6 = tpu.matmul %4, %5, %cst {dimension_numbers = #tpu.dot_dimension_numbers<[1], [0], [0], [1], [0, 0, 1, 1], [], []>} : vector<128x128xbf16>, vector<128x128xbf16>, vector<128x128xf32> -> vector<128x128xf32>
    %7 = arith.addf %3, %6 : vector<128x128xf32>
    %c0_6 = arith.constant 0 : index
    %c0_7 = arith.constant 0 : index
    %8 = vector.load %arg7[%c0_6, %c0_7] : memref<128x128xf32, #tpu.memory_space<vmem>>, vector<128x128xf32>
    tpu.vector_store %arg7[%c0_6, %c0_7], %7 {strides = array<i32>} : memref<128x128xf32, #tpu.memory_space<vmem>>, vector<128x128xf32>,
    %c0_i32_8 = arith.constant 0 : i32
    %9 = arith.cmpi eq, %arg1, %c0_i32_8 : i32
    %10 = arith.extui %9 : i1 to i32
    %c0_i32_9 = arith.constant 0 : i32
    %11 = arith.cmpi ne, %10, %c0_i32_9 : i32
    scf.if %11 {
      %c0_10 = arith.constant 0 : index
      %c0_11 = arith.constant 0 : index
      %12 = vector.load %arg7[%c0_10, %c0_11] : memref<128x128xf32, #tpu.memory_space<vmem>>, vector<128x128xf32>
      %c0_12 = arith.constant 0 : index
      %c0_13 = arith.constant 0 : index
      %13 = vector.load %arg4[%c0_12, %c0_13] : memref<128x1xf32, #tpu.memory_space<vmem>>, vector<128x1xf32>
      %14 = vector.broadcast %13 : vector<128x1xf32> to vector<128x128xf32>
      %15 = arith.mulf %12, %14 : vector<128x128xf32>
      %c0_14 = arith.constant 0 : index
      %c0_15 = arith.constant 0 : index
      %16 = vector.load %arg5[%c0_14, %c0_15] : memref<1x128xf32, #tpu.memory_space<vmem>>, vector<1x128xf32>
      %17 = vector.broadcast %16 : vector<1x128xf32> to vector<128x128xf32>
      %18 = arith.addf %15, %17 : vector<128x128xf32>
      %c0_16 = arith.constant 0 : index
      %c0_17 = arith.constant 0 : index
      %19 = vector.load %arg6[%c0_16, %c0_17] : memref<128x128xf32, #tpu.memory_space<vmem>>, vector<128x128xf32>
      tpu.vector_store %arg6[%c0_16, %c0_17], %18 {strides = array<i32>} : memref<128x128xf32, #tpu.memory_space<vmem>>, vector<128x128xf32>,
    } else {
    }
    return
  }
  func.func @transform_0(%arg0: i32, %arg1: i32) -> (i32, i32) {
    %c0_i32 = arith.constant 0 : i32
    return %arg0, %arg1 : i32, i32
  }
  func.func @transform_1(%arg0: i32, %arg1: i32) -> (i32, i32) {
    %c0_i32 = arith.constant 0 : i32
    %c0_i32_0 = arith.constant 0 : i32
    return %arg1, %c0_i32 : i32, i32
  }
  func.func @transform_2(%arg0: i32, %arg1: i32) -> (i32, i32) {
    %c0_i32 = arith.constant 0 : i32
    %c0_i32_0 = arith.constant 0 : i32
    return %arg0, %c0_i32 : i32, i32
  }
  func.func @transform_3(%arg0: i32, %arg1: i32) -> (i32, i32) {
    %c0_i32 = arith.constant 0 : i32
    %c0_i32_0 = arith.constant 0 : i32
    %c0_i32_1 = arith.constant 0 : i32
    return %c0_i32, %c0_i32_0 : i32, i32
  }
  func.func @transform_4(%arg0: i32, %arg1: i32) -> (i32, i32) {
    %c0_i32 = arith.constant 0 : i32
    %c0_i32_0 = arith.constant 0 : i32
    return %arg0, %c0_i32 : i32, i32
  }
}

</mosaic_0001>

<bundles_post_ra>
// kernel: _gcn_forward_impl.2
= control target key start
LH: loop header
LB: loop body
LE: loop exit
PB: predicated region body
PF: predicated region fallthrough
CT: control target
= control target key end

     0   :  { %v601_v1 = vmov 0   ;;  %s777_s1 = inlined_call_operand.vmem [shape: bf16[128,128], index: 1, kind: input, shape index: {}]   ;;  %s778_s0 = inlined_call_operand.vmem [shape: bf16[128,128], index: 0, kind: input, shape index: {}]   ;;  %s779_s2 = inlined_call_operand.vmem [shape: f32[128,1], index: 2, kind: input, shape index: {}]   ;;  %s780_s3 = inlined_call_operand.vmem [shape: f32[1,128], index: 3, kind: input, shape index: {}]   ;;  %s781_s4 = inlined_call_operand.vmem [shape: bf16[128,128], index: 4, kind: output, shape index: {}]  }
   0x1   :  { %v585_v0 = vld [vmem:[%s777_s1] sm:$0xff]   ;;  %584 = vset.pattern.permute.xlu1 %v601_v1  ;;  %583 = vset.pattern.permute.xlu0 %v601_v1  ;;  %v586_v2 = vld [vmem:[%s777_s1 + $0x8] sm:$0xff]   ;;  %v587_v3 = vld [vmem:[%s777_s1 + $0x10] sm:$0xff]  }
   0x2   :  { %534 = vmatprep.subr.bf16.mxu0 %v585_v0  ;;  %566 = vmatprep.subr.bf16.mxu1 %v585_v0  ;;  %v588_v4 = vld [vmem:[%s777_s1 + $0x18] sm:$0xff]   ;;  %v593_v5 = vld [vmem:[%s778_s0] sm:$0xff]   ;;  %v590_v8 = vld [vmem:[%s777_s1 + $0x28] sm:$0xff]  }
   0x3   :  { %535 = vmatpush3.bf16.msra.mxu0 %v585_v0  ;;  %574 = vmatpush3.bf16.msra.mxu1 %v585_v0  ;;  %v594_v6 = vld [vmem:[%s778_s0 + $0x20] sm:$0xff]   ;;  %v332_v9 = vld [vmem:[%s779_s2 + $0x10] sm:$0xff]  ;;  %v333_v11 = vld [vmem:[%s779_s2 + $0x18] sm:$0xff] }
   0x4   :  { %536 = vmatprep.subr.bf16.mxu0 %v586_v2  ;;  %567 = vmatprep.subr.bf16.mxu1 %v586_v2  ;;  %v589_v7 = vld [vmem:[%s777_s1 + $0x20] sm:$0xff]   ;;  %v331_v12 = vld [vmem:[%s779_s2 + $0x8] sm:$0xff]  ;;  %v591_v13 = vld [vmem:[%s777_s1 + $0x30] sm:$0xff]  }
   0x5   :  { %550 = vmatprep.mubr.bf16.mxu0 %v593_v5  ;;  %558 = vmatprep.mubr.bf16.mxu1 %v594_v6  ;;  %v330_v10 = vld [vmem:[%s779_s2] sm:$0xff]  ;;  %v335_v14 = vld [vmem:[%s779_s2 + $0x28] sm:$0xff]  ;;  %v592_v16 = vld [vmem:[%s777_s1 + $0x38] sm:$0xff]  }
   0x6   :  { %358 = vperm.xlu1 %584, %v332_v9   ;;  %348 = vperm.xlu0 %583, %v330_v10   ;;  %v334_v15 = vld [vmem:[%s779_s2 + $0x20] sm:$0xff]  ;;  %v337_v17 = vld [vmem:[%s779_s2 + $0x38] sm:$0xff]  ;;  %v336_v18 = vld [vmem:[%s779_s2 + $0x30] sm:$0xff] }
   0x7   :  { %537 = vmatpush3.bf16.msra.mxu0 %v586_v2  ;;  %575 = vmatpush3.bf16.msra.mxu1 %v586_v2  ;;  %v595_v19 = vld [vmem:[%s778_s0 + $0x8] sm:$0xff]   ;;  %v338_v22 = vld [vmem:[%s779_s2 + $0x40] sm:$0xff]  ;;  %v597_v23 = vld [vmem:[%s778_s0 + $0x10] sm:$0xff]  }
   0x8   :  { %538 = vmatprep.subr.bf16.mxu0 %v587_v3  ;;  %568 = vmatprep.subr.bf16.mxu1 %v587_v3  ;;  %v596_v20 = vld [vmem:[%s778_s0 + $0x28] sm:$0xff]   ;;  %v598_v24 = vld [vmem:[%s778_s0 + $0x30] sm:$0xff]   ;;  %v341_v25 = vld [vmem:[%s779_s2 + $0x58] sm:$0xff] }
   0x9   :  { %v339_v21 = vld [vmem:[%s779_s2 + $0x48] sm:$0xff]  ;;  %v340_v26 = vld [vmem:[%s779_s2 + $0x50] sm:$0xff]  ;;  %v599_v27 = vld [vmem:[%s778_s0 + $0x18] sm:$0xff]  }
   0xa   :  { %363 = vperm.xlu1 %584, %v333_v11   ;;  %353 = vperm.xlu0 %583, %v331_v12   ;;  %v600_v28 = vld [vmem:[%s778_s0 + $0x38] sm:$0xff]   ;;  %v343_v29 = vld [vmem:[%s779_s2 + $0x68] sm:$0xff]  ;;  %v342_v30 = vld [vmem:[%s779_s2 + $0x60] sm:$0xff] }
   0xb   :  { %539 = vmatpush3.bf16.msra.mxu0 %v587_v3  ;;  %576 = vmatpush3.bf16.msra.mxu1 %v587_v3  ;;  %v345_v31 = vld [vmem:[%s779_s2 + $0x78] sm:$0xff]  ;;  %v344_v32 = vld [vmem:[%s779_s2 + $0x70] sm:$0xff]  ;;  %v732_v48 = vld [vmem:[%s780_s3] ss:$0 sm:$0xff] }
   0xc   :  { %540 = vmatprep.subr.bf16.mxu0 %v588_v4  ;;  %569 = vmatprep.subr.bf16.mxu1 %v588_v4 }
   0xe   :  { %373 = vperm.xlu1 %584, %v335_v14   ;;  %368 = vperm.xlu0 %583, %v334_v15  }
   0xf   :  { %541 = vmatpush3.bf16.msra.mxu0 %v588_v4  ;;  %577 = vmatpush3.bf16.msra.mxu1 %v588_v4 }
  0x10   :  { %542 = vmatprep.subr.bf16.mxu0 %v589_v7  ;;  %570 = vmatprep.subr.bf16.mxu1 %v589_v7 }
  0x12   :  { %383 = vperm.xlu1 %584, %v337_v17   ;;  %378 = vperm.xlu0 %583, %v336_v18  }
  0x13   :  { %543 = vmatpush3.bf16.msra.mxu0 %v589_v7  ;;  %578 = vmatpush3.bf16.msra.mxu1 %v589_v7 }
  0x14   :  { %544 = vmatprep.subr.bf16.mxu0 %v590_v8  ;;  %571 = vmatprep.subr.bf16.mxu1 %v590_v8 }
  0x16   :  { %393 = vperm.xlu1 %584, %v339_v21   ;;  %388 = vperm.xlu0 %583, %v338_v22  }
  0x17   :  { %545 = vmatpush3.bf16.msra.mxu0 %v590_v8  ;;  %579 = vmatpush3.bf16.msra.mxu1 %v590_v8 }
  0x18   :  { %546 = vmatprep.subr.bf16.mxu0 %v591_v13  ;;  %572 = vmatprep.subr.bf16.mxu1 %v591_v13 }
  0x1a   :  { %403 = vperm.xlu1 %584, %v341_v25   ;;  %398 = vperm.xlu0 %583, %v340_v26  }
  0x1b   :  { %547 = vmatpush3.bf16.msra.mxu0 %v591_v13  ;;  %580 = vmatpush3.bf16.msra.mxu1 %v591_v13 }
  0x1c   :  { %548 = vmatprep.subr.bf16.mxu0 %v592_v16  ;;  %573 = vmatprep.subr.bf16.mxu1 %v592_v16 }
  0x1e   :  { %413 = vperm.xlu1 %584, %v343_v29   ;;  %408 = vperm.xlu0 %583, %v342_v30  }
  0x1f   :  { %549 = vmatpush3.bf16.msra.mxu0 %v592_v16  ;;  %581 = vmatpush3.bf16.msra.mxu1 %v592_v16 }
  0x22   :  { %551 = vmatmul.mubr.bf16.vlgmr.msra.gmra.mrb[0].mxu0 %v595_v19  ;;  %559 = vmatmul.mubr.bf16.vlgmr.msra.gmra.mrb[0].mxu1 %v596_v20 }
  0x23   :  { %554 = vmatprep.mubr.bf16.mxu0 %v597_v23  ;;  %562 = vmatprep.mubr.bf16.mxu1 %v598_v24 }
  0x24   :  { %423 = vperm.xlu1 %584, %v345_v31   ;;  %418 = vperm.xlu0 %583, %v344_v32  }
  0x2a   :  { %555 = vmatmul.mubr.bf16.gmra.mrb[4].mxu0 %v599_v27  ;;  %563 = vmatmul.mubr.bf16.gmra.mrb[4].mxu1 %v600_v28 }
  0x85   :  { %v359_v33 = vpop.permute.xlu1 %358  ;;  %v349_v34 = vpop.permute.xlu0 %348 }
  0x89   :  { %v364_v35 = vpop.permute.xlu1 %363  ;;  %v354_v36 = vpop.permute.xlu0 %353 }
  0x8d   :  { %v723_v37 = vpop.permute.xlu1 %373  ;;  %v369_v38 = vpop.permute.xlu0 %368 }
  0x91   :  { %v725_v39 = vpop.permute.xlu1 %383  ;;  %v379_v40 = vpop.permute.xlu0 %378 }
  0x95   :  { %v394_v41 = vpop.permute.xlu1 %393  ;;  %v389_v42 = vpop.permute.xlu0 %388 }
  0x99   :  { %v404_v43 = vpop.permute.xlu1 %403  ;;  %v399_v44 = vpop.permute.xlu0 %398 }
  0x9d   :  { %v727_v45 = vpop.permute.xlu1 %413  ;;  %v409_v46 = vpop.permute.xlu0 %408 }
  0xa3   :  { %v424_v8 = vpop.permute.xlu1 %423  ;;  %v419_v9 = vpop.permute.xlu0 %418 }
  0xf5   :  { %v552_v47 = vpop.f32.mrb[0].mxu0  ;;  %v560_v49 = vpop.f32.mrb[0].mxu1 }
  0xf6   :  { %v428_v50 = vmul.f32 %v552_v47, %v359_v33  ;;  %v436_v51 = vmul.f32 %v560_v49, %v399_v44  ;;  %v216_v52 = vpop.f32.mrb[1].mxu0  ;;  %v248_v53 = vpop.f32.mrb[1].mxu1 }
  0xf7   :  { %v426_v54 = vmul.f32 %v349_v34, %v216_v52  ;;  %v434_v55 = vmul.f32 %v389_v42, %v248_v53  ;;  %v553_v56 = vpop.f32.mrb[2].mxu0  ;;  %v561_v57 = vpop.f32.mrb[2].mxu1 }
  0xf8   :  { %v451_v58 = vadd.f32 %v732_v48, %v428_v50  ;;  %v459_v59 = vadd.f32 %v732_v48, %v436_v51  ;;  %v429_v60 = vmul.f32 %v553_v56, %v364_v35  ;;  %v437_v61 = vmul.f32 %v561_v57, %v404_v43  ;;  %v219_v62 = vpop.f32.mrb[3].mxu0  ;;  %v251_v63 = vpop.f32.mrb[3].mxu1 }
  0xf9   :  { %v449_v0 = vadd.f32 %v732_v48, %v426_v54  ;;  %v457_v1 = vadd.f32 %v732_v48, %v434_v55  ;;  %v427_v2 = vmul.f32 %v354_v36, %v219_v62  ;;  %v435_v3 = vmul.f32 %v394_v41, %v251_v63 }
  0xfa   :  { %v452_v4 = vadd.f32 %v732_v48, %v429_v60  ;;  %v460_v5 = vadd.f32 %v732_v48, %v437_v61  ;;  %v467_v10 = vmax.f32 %v451_v58, 0.0  ;;  %v475_v11 = vmax.f32 %v459_v59, 0.0 }
  0xfb   :  { %v450_v6 = vadd.f32 %v732_v48, %v427_v2  ;;  %v458_v7 = vadd.f32 %v732_v48, %v435_v3  ;;  %v465_v14 = vmax.f32 %v449_v0, 0.0  ;;  %v473_v15 = vmax.f32 %v457_v1, 0.0 }
  0xfc   :  { %v468_v12 = vmax.f32 %v452_v4, 0.0  ;;  %v476_v13 = vmax.f32 %v460_v5, 0.0 }
  0xfd   :  { %v466_v16 = vmax.f32 %v450_v6, 0.0  ;;  %v474_v17 = vmax.f32 %v458_v7, 0.0  ;;  %v556_v18 = vpop.f32.mrb[4].mxu0  ;;  %v564_v19 = vpop.f32.mrb[4].mxu1 }
  0xfe   :  { %v482_v20 = vpack.c.bf16 %v468_v12, %v467_v10  ;;  %v486_v21 = vpack.c.bf16 %v476_v13, %v475_v11  ;;  %v432_v22 = vmul.f32 %v556_v18, %v379_v40  ;;  %v440_v23 = vmul.f32 %v564_v19, %v419_v9  ;;  %v232_v24 = vpop.f32.mrb[5].mxu0  ;;  %v264_v25 = vpop.f32.mrb[5].mxu1 }
  0xff   :  { %v481_v26 = vpack.c.bf16 %v466_v16, %v465_v14  ;;  %v485_v27 = vpack.c.bf16 %v474_v17, %v473_v15  ;;  %v430_v28 = vmul.f32 %v369_v38, %v232_v24  ;;  %v438_v29 = vmul.f32 %v409_v46, %v264_v25  ;;  %v557_v30 = vpop.f32.mrb[6].mxu0  ;;  %v565_v31 = vpop.f32.mrb[6].mxu1 }
 0x100   :  { %490 = vst [vmem:[%s781_s4 + $0x8] sm:$0xff] %v482_v20  ;;  %494 = vst [vmem:[%s781_s4 + $0x28] sm:$0xff] %v486_v21  ;;  %v455_v32 = vadd.f32 %v732_v48, %v432_v22  ;;  %v463_v33 = vadd.f32 %v732_v48, %v440_v23  ;;  %v433_v34 = vmul.f32 %v557_v30, %v725_v39  ;;  %v235_v36 = vpop.f32.mrb[7].mxu0  ;;  %v267_v38 = vpop.f32.mrb[7].mxu1 }
 0x101   :  { %v441_v35 = vmul.f32 %v565_v31, %v424_v8  ;;  %489 = vst [vmem:[%s781_s4] sm:$0xff] %v481_v26  ;;  %493 = vst [vmem:[%s781_s4 + $0x20] sm:$0xff] %v485_v27  ;;  %v453_v40 = vadd.f32 %v732_v48, %v430_v28  ;;  %v461_v41 = vadd.f32 %v732_v48, %v438_v29 }
 0x102   :  { %v431_v42 = vmul.f32 %v723_v37, %v235_v36  ;;  %v439_v43 = vmul.f32 %v727_v45, %v267_v38  ;;  %v456_v39 = vadd.f32 %v732_v48, %v433_v34  ;;  %v471_v49 = vmax.f32 %v455_v32, 0.0 }
 0x103   :  { %v464_v44 = vadd.f32 %v732_v48, %v441_v35  ;;  %v479_v50 = vmax.f32 %v463_v33, 0.0  ;;  %v469_v53 = vmax.f32 %v453_v40, 0.0  ;;  %v477_v54 = vmax.f32 %v461_v41, 0.0 }
 0x104   :  { %v454_v46 = vadd.f32 %v732_v48, %v431_v42  ;;  %v462_v47 = vadd.f32 %v732_v48, %v439_v43  ;;  %v472_v51 = vmax.f32 %v456_v39, 0.0 }
 0x105   :  { %v480_v52 = vmax.f32 %v464_v44, 0.0 }
 0x106   :  { %v470_v55 = vmax.f32 %v454_v46, 0.0  ;;  %v478_v56 = vmax.f32 %v462_v47, 0.0  ;;  %v484_v57 = vpack.c.bf16 %v472_v51, %v471_v49 }
 0x107   :  { %v488_v37 = vpack.c.bf16 %v480_v52, %v479_v50 }
 0x108   :  { %v483_v58 = vpack.c.bf16 %v470_v55, %v469_v53  ;;  %v487_v45 = vpack.c.bf16 %v478_v56, %v477_v54  ;;  %492 = vst [vmem:[%s781_s4 + $0x18] sm:$0xff] %v484_v57 }
 0x109   :  { %496 = vst [vmem:[%s781_s4 + $0x38] sm:$0xff] %v488_v37 }
 0x10a   :  { %491 = vst [vmem:[%s781_s4 + $0x10] sm:$0xff] %v483_v58  ;;  %495 = vst [vmem:[%s781_s4 + $0x30] sm:$0xff] %v487_v45 }

// kernel: _gcn_forward_impl.3
= control target key start
LH: loop header
LB: loop body
LE: loop exit
PB: predicated region body
PF: predicated region fallthrough
CT: control target
= control target key end

     0   :  { %v585_v1 = vmov 0   ;;  %s761_s1 = inlined_call_operand.vmem [shape: bf16[128,128], index: 1, kind: input, shape index: {}]   ;;  %s762_s0 = inlined_call_operand.vmem [shape: bf16[128,128], index: 0, kind: input, shape index: {}]   ;;  %s763_s2 = inlined_call_operand.vmem [shape: f32[128,1], index: 2, kind: input, shape index: {}]   ;;  %s764_s3 = inlined_call_operand.vmem [shape: f32[1,128], index: 3, kind: input, shape index: {}]   ;;  %s765_s4 = inlined_call_operand.vmem [shape: f32[128,128], index: 4, kind: output, shape index: {}]  }
   0x1   :  { %v569_v0 = vld [vmem:[%s761_s1] sm:$0xff]   ;;  %568 = vset.pattern.permute.xlu1 %v585_v1  ;;  %567 = vset.pattern.permute.xlu0 %v585_v1  ;;  %v570_v2 = vld [vmem:[%s761_s1 + $0x8] sm:$0xff]   ;;  %v571_v3 = vld [vmem:[%s761_s1 + $0x10] sm:$0xff]  }
   0x2   :  { %518 = vmatprep.subr.bf16.mxu0 %v569_v0  ;;  %550 = vmatprep.subr.bf16.mxu1 %v569_v0  ;;  %v572_v4 = vld [vmem:[%s761_s1 + $0x18] sm:$0xff]   ;;  %v577_v5 = vld [vmem:[%s762_s0] sm:$0xff]   ;;  %v574_v8 = vld [vmem:[%s761_s1 + $0x28] sm:$0xff]  }
   0x3   :  { %519 = vmatpush3.bf16.msra.mxu0 %v569_v0  ;;  %558 = vmatpush3.bf16.msra.mxu1 %v569_v0  ;;  %v578_v6 = vld [vmem:[%s762_s0 + $0x20] sm:$0xff]   ;;  %v332_v9 = vld [vmem:[%s763_s2 + $0x10] sm:$0xff]  ;;  %v333_v11 = vld [vmem:[%s763_s2 + $0x18] sm:$0xff] }
   0x4   :  { %520 = vmatprep.subr.bf16.mxu0 %v570_v2  ;;  %551 = vmatprep.subr.bf16.mxu1 %v570_v2  ;;  %v573_v7 = vld [vmem:[%s761_s1 + $0x20] sm:$0xff]   ;;  %v331_v12 = vld [vmem:[%s763_s2 + $0x8] sm:$0xff]  ;;  %v575_v13 = vld [vmem:[%s761_s1 + $0x30] sm:$0xff]  }
   0x5   :  { %534 = vmatprep.mubr.bf16.mxu0 %v577_v5  ;;  %542 = vmatprep.mubr.bf16.mxu1 %v578_v6  ;;  %v330_v10 = vld [vmem:[%s763_s2] sm:$0xff]  ;;  %v335_v14 = vld [vmem:[%s763_s2 + $0x28] sm:$0xff]  ;;  %v576_v16 = vld [vmem:[%s761_s1 + $0x38] sm:$0xff]  }
   0x6   :  { %358 = vperm.xlu1 %568, %v332_v9   ;;  %348 = vperm.xlu0 %567, %v330_v10   ;;  %v334_v15 = vld [vmem:[%s763_s2 + $0x20] sm:$0xff]  ;;  %v337_v17 = vld [vmem:[%s763_s2 + $0x38] sm:$0xff]  ;;  %v336_v18 = vld [vmem:[%s763_s2 + $0x30] sm:$0xff] }
   0x7   :  { %521 = vmatpush3.bf16.msra.mxu0 %v570_v2  ;;  %559 = vmatpush3.bf16.msra.mxu1 %v570_v2  ;;  %v579_v19 = vld [vmem:[%s762_s0 + $0x8] sm:$0xff]   ;;  %v338_v22 = vld [vmem:[%s763_s2 + $0x40] sm:$0xff]  ;;  %v581_v23 = vld [vmem:[%s762_s0 + $0x10] sm:$0xff]  }
   0x8   :  { %522 = vmatprep.subr.bf16.mxu0 %v571_v3  ;;  %552 = vmatprep.subr.bf16.mxu1 %v571_v3  ;;  %v580_v20 = vld [vmem:[%s762_s0 + $0x28] sm:$0xff]   ;;  %v582_v24 = vld [vmem:[%s762_s0 + $0x30] sm:$0xff]   ;;  %v341_v25 = vld [vmem:[%s763_s2 + $0x58] sm:$0xff] }
   0x9   :  { %v339_v21 = vld [vmem:[%s763_s2 + $0x48] sm:$0xff]  ;;  %v340_v26 = vld [vmem:[%s763_s2 + $0x50] sm:$0xff]  ;;  %v583_v27 = vld [vmem:[%s762_s0 + $0x18] sm:$0xff]  }
   0xa   :  { %363 = vperm.xlu1 %568, %v333_v11   ;;  %353 = vperm.xlu0 %567, %v331_v12   ;;  %v584_v28 = vld [vmem:[%s762_s0 + $0x38] sm:$0xff]   ;;  %v343_v29 = vld [vmem:[%s763_s2 + $0x68] sm:$0xff]  ;;  %v342_v30 = vld [vmem:[%s763_s2 + $0x60] sm:$0xff] }
   0xb   :  { %523 = vmatpush3.bf16.msra.mxu0 %v571_v3  ;;  %560 = vmatpush3.bf16.msra.mxu1 %v571_v3  ;;  %v345_v31 = vld [vmem:[%s763_s2 + $0x78] sm:$0xff]  ;;  %v344_v32 = vld [vmem:[%s763_s2 + $0x70] sm:$0xff]  ;;  %v501_v48 = vld [vmem:[%s764_s3] ss:$0 sm:$0xff] }
   0xc   :  { %524 = vmatprep.subr.bf16.mxu0 %v572_v4  ;;  %553 = vmatprep.subr.bf16.mxu1 %v572_v4 }
   0xe   :  { %373 = vperm.xlu1 %568, %v335_v14   ;;  %368 = vperm.xlu0 %567, %v334_v15  }
   0xf   :  { %525 = vmatpush3.bf16.msra.mxu0 %v572_v4  ;;  %561 = vmatpush3.bf16.msra.mxu1 %v572_v4 }
  0x10   :  { %526 = vmatprep.subr.bf16.mxu0 %v573_v7  ;;  %554 = vmatprep.subr.bf16.mxu1 %v573_v7 }
  0x12   :  { %383 = vperm.xlu1 %568, %v337_v17   ;;  %378 = vperm.xlu0 %567, %v336_v18  }
  0x13   :  { %527 = vmatpush3.bf16.msra.mxu0 %v573_v7  ;;  %562 = vmatpush3.bf16.msra.mxu1 %v573_v7 }
  0x14   :  { %528 = vmatprep.subr.bf16.mxu0 %v574_v8  ;;  %555 = vmatprep.subr.bf16.mxu1 %v574_v8 }
  0x16   :  { %393 = vperm.xlu1 %568, %v339_v21   ;;  %388 = vperm.xlu0 %567, %v338_v22  }
  0x17   :  { %529 = vmatpush3.bf16.msra.mxu0 %v574_v8  ;;  %563 = vmatpush3.bf16.msra.mxu1 %v574_v8 }
  0x18   :  { %530 = vmatprep.subr.bf16.mxu0 %v575_v13  ;;  %556 = vmatprep.subr.bf16.mxu1 %v575_v13 }
  0x1a   :  { %403 = vperm.xlu1 %568, %v341_v25   ;;  %398 = vperm.xlu0 %567, %v340_v26  }
  0x1b   :  { %531 = vmatpush3.bf16.msra.mxu0 %v575_v13  ;;  %564 = vmatpush3.bf16.msra.mxu1 %v575_v13 }
  0x1c   :  { %532 = vmatprep.subr.bf16.mxu0 %v576_v16  ;;  %557 = vmatprep.subr.bf16.mxu1 %v576_v16 }
  0x1e   :  { %413 = vperm.xlu1 %568, %v343_v29   ;;  %408 = vperm.xlu0 %567, %v342_v30  }
  0x1f   :  { %533 = vmatpush3.bf16.msra.mxu0 %v576_v16  ;;  %565 = vmatpush3.bf16.msra.mxu1 %v576_v16 }
  0x22   :  { %535 = vmatmul.mubr.bf16.vlgmr.msra.gmra.mrb[0].mxu0 %v579_v19  ;;  %543 = vmatmul.mubr.bf16.vlgmr.msra.gmra.mrb[0].mxu1 %v580_v20 }
  0x23   :  { %538 = vmatprep.mubr.bf16.mxu0 %v581_v23  ;;  %546 = vmatprep.mubr.bf16.mxu1 %v582_v24 }
  0x24   :  { %423 = vperm.xlu1 %568, %v345_v31   ;;  %418 = vperm.xlu0 %567, %v344_v32  }
  0x2a   :  { %539 = vmatmul.mubr.bf16.gmra.mrb[4].mxu0 %v583_v27  ;;  %547 = vmatmul.mubr.bf16.gmra.mrb[4].mxu1 %v584_v28 }
  0x85   :  { %v359_v33 = vpop.permute.xlu1 %358  ;;  %v349_v34 = vpop.permute.xlu0 %348 }
  0x89   :  { %v364_v35 = vpop.permute.xlu1 %363  ;;  %v354_v36 = vpop.permute.xlu0 %353 }
  0x8d   :  { %v707_v37 = vpop.permute.xlu1 %373  ;;  %v369_v38 = vpop.permute.xlu0 %368 }
  0x91   :  { %v384_v39 = vpop.permute.xlu1 %383  ;;  %v379_v40 = vpop.permute.xlu0 %378 }
  0x95   :  { %v394_v41 = vpop.permute.xlu1 %393  ;;  %v389_v42 = vpop.permute.xlu0 %388 }
  0x99   :  { %v404_v43 = vpop.permute.xlu1 %403  ;;  %v399_v44 = vpop.permute.xlu0 %398 }
  0x9d   :  { %v414_v45 = vpop.permute.xlu1 %413  ;;  %v409_v46 = vpop.permute.xlu0 %408 }
  0xa3   :  { %v424_v8 = vpop.permute.xlu1 %423  ;;  %v419_v9 = vpop.permute.xlu0 %418 }
  0xf5   :  { %v536_v47 = vpop.f32.mrb[0].mxu0  ;;  %v544_v49 = vpop.f32.mrb[0].mxu1 }
  0xf6   :  { %v428_v50 = vmul.f32 %v536_v47, %v359_v33  ;;  %v436_v51 = vmul.f32 %v544_v49, %v399_v44  ;;  %v216_v52 = vpop.f32.mrb[1].mxu0  ;;  %v248_v53 = vpop.f32.mrb[1].mxu1 }
  0xf7   :  { %v426_v54 = vmul.f32 %v349_v34, %v216_v52  ;;  %v434_v55 = vmul.f32 %v389_v42, %v248_v53  ;;  %v537_v56 = vpop.f32.mrb[2].mxu0  ;;  %v545_v57 = vpop.f32.mrb[2].mxu1 }
  0xf8   :  { %v451_v58 = vadd.f32 %v501_v48, %v428_v50  ;;  %v459_v59 = vadd.f32 %v501_v48, %v436_v51  ;;  %v429_v60 = vmul.f32 %v537_v56, %v364_v35  ;;  %v437_v61 = vmul.f32 %v545_v57, %v404_v43  ;;  %v219_v62 = vpop.f32.mrb[3].mxu0  ;;  %v251_v63 = vpop.f32.mrb[3].mxu1 }
  0xf9   :  { %v449_v0 = vadd.f32 %v501_v48, %v426_v54  ;;  %v457_v1 = vadd.f32 %v501_v48, %v434_v55  ;;  %v427_v2 = vmul.f32 %v354_v36, %v219_v62  ;;  %v435_v3 = vmul.f32 %v394_v41, %v251_v63 }
  0xfa   :  { %467 = vst [vmem:[%s765_s4 + $0x10] sm:$0xff] %v451_v58  ;;  %475 = vst [vmem:[%s765_s4 + $0x50] sm:$0xff] %v459_v59  ;;  %v452_v4 = vadd.f32 %v501_v48, %v429_v60  ;;  %v460_v5 = vadd.f32 %v501_v48, %v437_v61 }
  0xfb   :  { %465 = vst [vmem:[%s765_s4] sm:$0xff] %v449_v0  ;;  %473 = vst [vmem:[%s765_s4 + $0x40] sm:$0xff] %v457_v1  ;;  %v450_v6 = vadd.f32 %v501_v48, %v427_v2  ;;  %v458_v7 = vadd.f32 %v501_v48, %v435_v3 }
  0xfc   :  { %468 = vst [vmem:[%s765_s4 + $0x18] sm:$0xff] %v452_v4  ;;  %476 = vst [vmem:[%s765_s4 + $0x58] sm:$0xff] %v460_v5 }
  0xfd   :  { %466 = vst [vmem:[%s765_s4 + $0x8] sm:$0xff] %v450_v6  ;;  %474 = vst [vmem:[%s765_s4 + $0x48] sm:$0xff] %v458_v7  ;;  %v540_v10 = vpop.f32.mrb[4].mxu0  ;;  %v548_v11 = vpop.f32.mrb[4].mxu1 }
  0xfe   :  { %v432_v12 = vmul.f32 %v540_v10, %v379_v40  ;;  %v440_v13 = vmul.f32 %v548_v11, %v419_v9  ;;  %v232_v14 = vpop.f32.mrb[5].mxu0  ;;  %v264_v15 = vpop.f32.mrb[5].mxu1 }
  0xff   :  { %v430_v16 = vmul.f32 %v369_v38, %v232_v14  ;;  %v438_v17 = vmul.f32 %v409_v46, %v264_v15  ;;  %v541_v18 = vpop.f32.mrb[6].mxu0  ;;  %v549_v19 = vpop.f32.mrb[6].mxu1 }
 0x100   :  { %v455_v20 = vadd.f32 %v501_v48, %v432_v12  ;;  %v463_v21 = vadd.f32 %v501_v48, %v440_v13  ;;  %v433_v22 = vmul.f32 %v541_v18, %v384_v39  ;;  %v441_v23 = vmul.f32 %v549_v19, %v424_v8  ;;  %v235_v24 = vpop.f32.mrb[7].mxu0  ;;  %v267_v25 = vpop.f32.mrb[7].mxu1 }
 0x101   :  { %v453_v26 = vadd.f32 %v501_v48, %v430_v16  ;;  %v461_v27 = vadd.f32 %v501_v48, %v438_v17  ;;  %v431_v28 = vmul.f32 %v707_v37, %v235_v24  ;;  %v439_v29 = vmul.f32 %v414_v45, %v267_v25 }
 0x102   :  { %471 = vst [vmem:[%s765_s4 + $0x30] sm:$0xff] %v455_v20  ;;  %479 = vst [vmem:[%s765_s4 + $0x70] sm:$0xff] %v463_v21  ;;  %v456_v30 = vadd.f32 %v501_v48, %v433_v22  ;;  %v464_v31 = vadd.f32 %v501_v48, %v441_v23 }
 0x103   :  { %469 = vst [vmem:[%s765_s4 + $0x20] sm:$0xff] %v453_v26  ;;  %477 = vst [vmem:[%s765_s4 + $0x60] sm:$0xff] %v461_v27  ;;  %v454_v32 = vadd.f32 %v501_v48, %v431_v28  ;;  %v462_v33 = vadd.f32 %v501_v48, %v439_v29 }
 0x104   :  { %472 = vst [vmem:[%s765_s4 + $0x38] sm:$0xff] %v456_v30  ;;  %480 = vst [vmem:[%s765_s4 + $0x78] sm:$0xff] %v464_v31 }
 0x105   :  { %470 = vst [vmem:[%s765_s4 + $0x28] sm:$0xff] %v454_v32  ;;  %478 = vst [vmem:[%s765_s4 + $0x68] sm:$0xff] %v462_v33 }

</bundles_post_ra>
